<compile_context>
chip_gen: v7x
topology: tpu7x:2x2x1
jax: 0.10.0
libtpu: 0.0.40
codegen_flags: <defaults>
</compile_context>

<pallas_src>
import jax
import jax.numpy as jnp
from jax.experimental import pallas as pl
from jax.experimental.pallas import tpu as pltpu

IN_DIM = 320
HID = 320
OUT_DIM = 2
MAX_TILE_B = 1024  # per-tile VMEM is a few MB -> large headroom even on v7x's 64 MiB


def _round_up(n, m):
    return ((n + m - 1) // m) * m


def _cdiv(a, b):
    return (a + b - 1) // b


def _default_out_pad():
    # v5e is MXU-bound for this kernel (197 TF/s vs ~820 GB/s) and has one vst
    # slot: keep the lane-dense 128-wide padded output there (writeback hides
    # under MXU work).  v6e/v7x are HBM-bound: an 8-wide f32 output cuts the
    # output writeback + wrapper-slice traffic 16x.
    try:
        kind = jax.devices()[0].device_kind.lower()
    except Exception:
        kind = ""
    if "v5 lite" in kind or "v5e" in kind or "v5lite" in kind:
        return 128
    return 8


def fcc_kernel(x_ref,
               w1_ref, b1_ref,
               w2_ref, b2_ref,
               w3_ref, b3_ref,
               w4_ref, b4_ref,
               o_ref):
    # Cast x to bf16 in-kernel (x arrives as f32; no separate HBM cast pass).
    # All matmuls feed the MXU with bf16 operands and accumulate in f32.
    x = x_ref[...].astype(jnp.bfloat16)
    h = jnp.dot(x, w1_ref[...], preferred_element_type=jnp.float32) + b1_ref[...]
    h = jnp.dot(h.astype(jnp.bfloat16), w2_ref[...],
                preferred_element_type=jnp.float32) + b2_ref[...]
    h = jnp.dot(h.astype(jnp.bfloat16), w3_ref[...],
                preferred_element_type=jnp.float32) + b3_ref[...]
    o_ref[...] = (jnp.dot(h.astype(jnp.bfloat16), w4_ref[...],
                          preferred_element_type=jnp.float32)
                  + b4_ref[...]).astype(o_ref.dtype)


def fcc_forward(x, params, *, tile_b=None, out_pad=None):
    """x: (B, 320) float32.  params: list of (W(in,out) f32, b(1,out) f32) for the 4 layers."""
    B = x.shape[0]
    if out_pad is None:
        out_pad = _default_out_pad()

    if tile_b is None:
        if B <= MAX_TILE_B:
            tile_b = max(8, _round_up(B, 8))
        else:
            # Force an even number of grid steps so the "parallel" batch axis
            # splits evenly across v7x's two TensorCores.
            n_tiles = 2 * _cdiv(B, 2 * MAX_TILE_B)
            tile_b = _round_up(_cdiv(B, n_tiles), 8)

    (w1, b1), (w2, b2), (w3, b3), (w4, b4) = params

    # MXU-native bf16 weights; biases stay f32 (added to the f32 accumulator).
    w1b = w1.astype(jnp.bfloat16)
    w2b = w2.astype(jnp.bfloat16)
    w3b = w3.astype(jnp.bfloat16)
    # Zero-pad the 320x2 last layer to `out_pad` columns; wrapper slices [:, :2].
    w4p = jnp.zeros((HID, out_pad), jnp.bfloat16).at[:, :OUT_DIM].set(
        w4.astype(jnp.bfloat16))
    b4p = jnp.zeros((1, out_pad), jnp.float32).at[:, :OUT_DIM].set(b4)

    grid = (_cdiv(B, tile_b),)

    def full_spec(arr):
        # Full-array block with a constant index_map: block index never changes
        # across grid steps, so the block stays resident in VMEM (no re-DMA).
        return pl.BlockSpec(arr.shape, lambda i: (0,) * arr.ndim)

    in_specs = [
        # x stays f32 in HBM.  A ragged last block (B % tile_b != 0) reads
        # unspecified rows, but a row-wise matmul never mixes rows and those
        # output rows fall outside (B, out_pad), so they are dropped safely.
        pl.BlockSpec((tile_b, IN_DIM), lambda i: (i, 0)),
        full_spec(w1b), full_spec(b1),
        full_spec(w2b), full_spec(b2),
        full_spec(w3b), full_spec(b3),
        full_spec(w4p), full_spec(b4p),
    ]
    out_spec = pl.BlockSpec((tile_b, out_pad), lambda i: (i, 0))

    out_padded = pl.pallas_call(
        fcc_kernel,
        out_shape=jax.ShapeDtypeStruct((B, out_pad), jnp.float32),
        grid_spec=pltpu.PrefetchScalarGridSpec(
            num_scalar_prefetch=0,
            grid=grid,
            in_specs=in_specs,
            out_specs=out_spec,
        ),
        compiler_params=pltpu.CompilerParams(
            dimension_semantics=("parallel",),
        ),
    )(x, w1b, b1, w2b, b2, w3b, b3, w4p, b4p)

    # Drop the padded output columns (only 8 or 128 wide -> cheap slice).
    return out_padded[:, :OUT_DIM].astype(x.dtype)


def init_fcc_params(key):
    """Deterministic init matching nn.Linear's default: U(-1/sqrt(fan_in), 1/sqrt(fan_in))."""
    dims = [(IN_DIM, HID), (HID, HID), (HID, HID), (HID, OUT_DIM)]
    params = []
    for (fan_in, fan_out) in dims:
        key, kw, kb = jax.random.split(key, 3)
        bound = 1.0 / jnp.sqrt(float(fan_in))
        # Stored as (in, out) so the kernel computes x @ W + b (== x @ W_pt.T + b).
        w = jax.random.uniform(kw, (fan_in, fan_out), jnp.float32, -bound, bound)
        b = jax.random.uniform(kb, (1, fan_out), jnp.float32, -bound, bound)
        params.append((w, b))
    return params


def fcc_reference_f32(x, params):
    """True f32 nn.Linear semantics (highest-precision matmuls) for validation."""
    h = x
    for (w, b) in params:
        h = jnp.dot(h, w, precision=jax.lax.Precision.HIGHEST) + b
    return h


if __name__ == "__main__":
    key = jax.random.PRNGKey(0)
    kx, kp = jax.random.split(key)

    batch = 8
    x = jax.random.normal(kx, (batch, IN_DIM), jnp.float32)
    params = init_fcc_params(kp)

    out = jax.block_until_ready(fcc_forward(x, params))
    ref = fcc_reference_f32(x, params)

    assert out.shape == (batch, OUT_DIM), out.shape
    max_err = float(jnp.max(jnp.abs(out - ref)))
    # Tolerance covers bf16 MXU operand rounding (f32 accumulation) over 4 layers.
    assert max_err < 2e-2, max_err

    print("KERNEL_OK")
</pallas_src>

<mosaic_0001>
module attributes {stable_mosaic.version = 11 : i64} {
  func.func @fcc_kernel(%arg0: i32, %arg1: memref<8x320xf32, #tpu.memory_space<vmem>>, %arg2: memref<320x320xbf16, #tpu.memory_space<vmem>>, %arg3: memref<1x320xf32, #tpu.memory_space<vmem>>, %arg4: memref<320x320xbf16, #tpu.memory_space<vmem>>, %arg5: memref<1x320xf32, #tpu.memory_space<vmem>>, %arg6: memref<320x320xbf16, #tpu.memory_space<vmem>>, %arg7: memref<1x320xf32, #tpu.memory_space<vmem>>, %arg8: memref<320x8xbf16, #tpu.memory_space<vmem>>, %arg9: memref<1x8xf32, #tpu.memory_space<vmem>>, %arg10: memref<8x8xf32, #tpu.memory_space<vmem>>) attributes {dimension_semantics = [#tpu.dimension_semantics<parallel>], iteration_bounds = array<i64: 1>, scalar_prefetch = 0 : i64, scratch_operands = 0 : i64, tpu.core_type = #tpu.core_type<tc>, window_params = [{transform_indices = @transform_0, window_bounds = array<i64: 8, 320>}, {pipeline_mode = #tpu.pipeline_mode<synchronous>, transform_indices = @transform_1, window_bounds = array<i64: 320, 320>}, {pipeline_mode = #tpu.pipeline_mode<synchronous>, transform_indices = @transform_2, window_bounds = array<i64: 1, 320>}, {pipeline_mode = #tpu.pipeline_mode<synchronous>, transform_indices = @transform_3, window_bounds = array<i64: 320, 320>}, {pipeline_mode = #tpu.pipeline_mode<synchronous>, transform_indices = @transform_4, window_bounds = array<i64: 1, 320>}, {pipeline_mode = #tpu.pipeline_mode<synchronous>, transform_indices = @transform_5, window_bounds = array<i64: 320, 320>}, {pipeline_mode = #tpu.pipeline_mode<synchronous>, transform_indices = @transform_6, window_bounds = array<i64: 1, 320>}, {pipeline_mode = #tpu.pipeline_mode<synchronous>, transform_indices = @transform_7, window_bounds = array<i64: 320, 8>}, {pipeline_mode = #tpu.pipeline_mode<synchronous>, transform_indices = @transform_8, window_bounds = array<i64: 1, 8>}, {transform_indices = @transform_9, window_bounds = array<i64: 8, 8>}]} {
    %c0 = arith.constant 0 : index
    %c0_0 = arith.constant 0 : index
    %0 = vector.load %arg1[%c0, %c0_0] : memref<8x320xf32, #tpu.memory_space<vmem>>, vector<8x320xf32>
    %1 = arith.truncf %0 : vector<8x320xf32> to vector<8x320xbf16>
    %c0_1 = arith.constant 0 : index
    %c0_2 = arith.constant 0 : index
    %2 = vector.load %arg2[%c0_1, %c0_2] : memref<320x320xbf16, #tpu.memory_space<vmem>>, vector<320x320xbf16>
    %cst = arith.constant dense<0.000000e+00> : vector<8x320xf32>
    %3 = tpu.matmul %1, %2, %cst {dimension_numbers = #tpu.dot_dimension_numbers<[1], [0], [0], [1], [0, 0, 1, 1], [], []>} : vector<8x320xbf16>, vector<320x320xbf16>, vector<8x320xf32> -> vector<8x320xf32>
    %c0_3 = arith.constant 0 : index
    %c0_4 = arith.constant 0 : index
    %4 = vector.load %arg3[%c0_3, %c0_4] : memref<1x320xf32, #tpu.memory_space<vmem>>, vector<1x320xf32>
    %5 = vector.broadcast %4 : vector<1x320xf32> to vector<8x320xf32>
    %6 = arith.addf %3, %5 : vector<8x320xf32>
    %7 = arith.truncf %6 : vector<8x320xf32> to vector<8x320xbf16>
    %c0_5 = arith.constant 0 : index
    %c0_6 = arith.constant 0 : index
    %8 = vector.load %arg4[%c0_5, %c0_6] : memref<320x320xbf16, #tpu.memory_space<vmem>>, vector<320x320xbf16>
    %cst_7 = arith.constant dense<0.000000e+00> : vector<8x320xf32>
    %9 = tpu.matmul %7, %8, %cst_7 {dimension_numbers = #tpu.dot_dimension_numbers<[1], [0], [0], [1], [0, 0, 1, 1], [], []>} : vector<8x320xbf16>, vector<320x320xbf16>, vector<8x320xf32> -> vector<8x320xf32>
    %c0_8 = arith.constant 0 : index
    %c0_9 = arith.constant 0 : index
    %10 = vector.load %arg5[%c0_8, %c0_9] : memref<1x320xf32, #tpu.memory_space<vmem>>, vector<1x320xf32>
    %11 = vector.broadcast %10 : vector<1x320xf32> to vector<8x320xf32>
    %12 = arith.addf %9, %11 : vector<8x320xf32>
    %13 = arith.truncf %12 : vector<8x320xf32> to vector<8x320xbf16>
    %c0_10 = arith.constant 0 : index
    %c0_11 = arith.constant 0 : index
    %14 = vector.load %arg6[%c0_10, %c0_11] : memref<320x320xbf16, #tpu.memory_space<vmem>>, vector<320x320xbf16>
    %cst_12 = arith.constant dense<0.000000e+00> : vector<8x320xf32>
    %15 = tpu.matmul %13, %14, %cst_12 {dimension_numbers = #tpu.dot_dimension_numbers<[1], [0], [0], [1], [0, 0, 1, 1], [], []>} : vector<8x320xbf16>, vector<320x320xbf16>, vector<8x320xf32> -> vector<8x320xf32>
    %c0_13 = arith.constant 0 : index
    %c0_14 = arith.constant 0 : index
    %16 = vector.load %arg7[%c0_13, %c0_14] : memref<1x320xf32, #tpu.memory_space<vmem>>, vector<1x320xf32>
    %17 = vector.broadcast %16 : vector<1x320xf32> to vector<8x320xf32>
    %18 = arith.addf %15, %17 : vector<8x320xf32>
    %19 = arith.truncf %18 : vector<8x320xf32> to vector<8x320xbf16>
    %c0_15 = arith.constant 0 : index
    %c0_16 = arith.constant 0 : index
    %20 = vector.load %arg8[%c0_15, %c0_16] : memref<320x8xbf16, #tpu.memory_space<vmem>>, vector<320x8xbf16>
    %cst_17 = arith.constant dense<0.000000e+00> : vector<8x8xf32>
    %21 = tpu.matmul %19, %20, %cst_17 {dimension_numbers = #tpu.dot_dimension_numbers<[1], [0], [0], [1], [0, 0, 1, 1], [], []>} : vector<8x320xbf16>, vector<320x8xbf16>, vector<8x8xf32> -> vector<8x8xf32>
    %c0_18 = arith.constant 0 : index
    %c0_19 = arith.constant 0 : index
    %22 = vector.load %arg9[%c0_18, %c0_19] : memref<1x8xf32, #tpu.memory_space<vmem>>, vector<1x8xf32>
    %23 = vector.broadcast %22 : vector<1x8xf32> to vector<8x8xf32>
    %24 = arith.addf %21, %23 : vector<8x8xf32>
    %c0_20 = arith.constant 0 : index
    %c0_21 = arith.constant 0 : index
    %25 = vector.load %arg10[%c0_20, %c0_21] : memref<8x8xf32, #tpu.memory_space<vmem>>, vector<8x8xf32>
    tpu.vector_store %arg10[%c0_20, %c0_21], %24 {strides = array<i32>} : memref<8x8xf32, #tpu.memory_space<vmem>>, vector<8x8xf32>,
    return
  }
  func.func @transform_0(%arg0: i32) -> (i32, i32) {
    %c0_i32 = arith.constant 0 : i32
    %c0_i32_0 = arith.constant 0 : i32
    return %arg0, %c0_i32 : i32, i32
  }
  func.func @transform_1(%arg0: i32) -> (i32, i32) {
    %c0_i32 = arith.constant 0 : i32
    %c0_i32_0 = arith.constant 0 : i32
    %c0_i32_1 = arith.constant 0 : i32
    return %c0_i32, %c0_i32_0 : i32, i32
  }
  func.func @transform_2(%arg0: i32) -> (i32, i32) {
    %c0_i32 = arith.constant 0 : i32
    %c0_i32_0 = arith.constant 0 : i32
    %c0_i32_1 = arith.constant 0 : i32
    return %c0_i32, %c0_i32_0 : i32, i32
  }
  func.func @transform_3(%arg0: i32) -> (i32, i32) {
    %c0_i32 = arith.constant 0 : i32
    %c0_i32_0 = arith.constant 0 : i32
    %c0_i32_1 = arith.constant 0 : i32
    return %c0_i32, %c0_i32_0 : i32, i32
  }
  func.func @transform_4(%arg0: i32) -> (i32, i32) {
    %c0_i32 = arith.constant 0 : i32
    %c0_i32_0 = arith.constant 0 : i32
    %c0_i32_1 = arith.constant 0 : i32
    return %c0_i32, %c0_i32_0 : i32, i32
  }
  func.func @transform_5(%arg0: i32) -> (i32, i32) {
    %c0_i32 = arith.constant 0 : i32
    %c0_i32_0 = arith.constant 0 : i32
    %c0_i32_1 = arith.constant 0 : i32
    return %c0_i32, %c0_i32_0 : i32, i32
  }
  func.func @transform_6(%arg0: i32) -> (i32, i32) {
    %c0_i32 = arith.constant 0 : i32
    %c0_i32_0 = arith.constant 0 : i32
    %c0_i32_1 = arith.constant 0 : i32
    return %c0_i32, %c0_i32_0 : i32, i32
  }
  func.func @transform_7(%arg0: i32) -> (i32, i32) {
    %c0_i32 = arith.constant 0 : i32
    %c0_i32_0 = arith.constant 0 : i32
    %c0_i32_1 = arith.constant 0 : i32
    return %c0_i32, %c0_i32_0 : i32, i32
  }
  func.func @transform_8(%arg0: i32) -> (i32, i32) {
    %c0_i32 = arith.constant 0 : i32
    %c0_i32_0 = arith.constant 0 : i32
    %c0_i32_1 = arith.constant 0 : i32
    return %c0_i32, %c0_i32_0 : i32, i32
  }
  func.func @transform_9(%arg0: i32) -> (i32, i32) {
    %c0_i32 = arith.constant 0 : i32
    %c0_i32_0 = arith.constant 0 : i32
    return %arg0, %c0_i32 : i32, i32
  }
}

</mosaic_0001>

<bundles_post_ra>
// kernel: tpu_custom_call.1
= control target key start
LH: loop header
LB: loop body
LE: loop exit
PB: predicated region body
PF: predicated region fallthrough
CT: control target
= control target key end

     0   :  { %14 = vsyncpa [#allocation3], 0  ;;  %s3103_s0 = inlined_call_operand.vmem [shape: f32[8,320], index: 0, kind: input, shape index: {}]   ;;  %s3104_s1 = inlined_call_operand.hbm [shape: bf16[320,320], index: 1, kind: input, shape index: {}]   ;;  %s3105_s2 = inlined_call_operand.vmem [shape: f32[1,320], index: 2, kind: input, shape index: {}]   ;;  %s3106_s3 = inlined_call_operand.hbm [shape: bf16[320,320], index: 3, kind: input, shape index: {}]   ;;  %s3107_s4 = inlined_call_operand.vmem [shape: f32[1,320], index: 4, kind: input, shape index: {}]   ;;  %s3108_s5 = inlined_call_operand.hbm [shape: bf16[320,320], index: 5, kind: input, shape index: {}]   ;;  %s3109_s6 = inlined_call_operand.vmem [shape: f32[1,320], index: 6, kind: input, shape index: {}]   ;;  %s3110_s7 = inlined_call_operand.vmem [shape: bf16[320,8], index: 7, kind: input, shape index: {}]   ;;  %s3111_s8 = inlined_call_operand.vmem [shape: f32[1,8], index: 8, kind: input, shape index: {}]   ;;  %s3112_s9 = inlined_call_operand.hbm [shape: f32[8,8], index: 9, kind: output, shape index: {}]  }
   0x1   :  { %15 = vsyncpa [#allocation6], 0 }
   0x2   :  { %16 = vsyncpa [#allocation4], 0  ;;  %s2850_s30 = smov [#allocation5]   ;;  %s2851_s11 = smov [#allocation2]  }
   0x3   :  { %s38_s10 = sshll.u32 %s2850_s30, 4  ;;  %s24_s12 = sshll.u32 %s2851_s11, 4  ;;  %s39_s10 = int_to_ptr.vmem [resolvable:$true] %s38_s10  ;;  %s2909_s12 = int_to_ptr.vmem [resolvable:$true] %s24_s12 }
   0x4   :  { %s2756_s15 = scalar_lea.hbm %s3106_s3, 7680 }
   0x5   :  { %p2757_p0 = scmp.ne.s32.totalorder %s3106_s3, %s2756_s15  ;;  %p2760_p1 = scmp.lt.u32.totalorder %s2756_s15, %s3106_s3 }
   0x7   :  { %p2762_p2 = pnand %p2760_p1, %p2757_p0 }
   0x9   :  { %2765 = shalt.err (!%p2762_p2)
}
   0xa   :  { %s2766_s20 = scalar_lea.vmem %s39_s10, 7680  ;;  %p2771_p4 = scmp.lt.s32.totalorder %s39_s10, %s39_s10 }
   0xb   :  { %p2767_p3 = scmp.ne.s32.totalorder %s39_s10, %s2766_s20  ;;  %p2772_p5 = scmp.lt.s32.totalorder %s2766_s20, %s2766_s20 }
   0xd   :  { %p2773_p6 = por %p2772_p5, %p2771_p4 }
   0xf   :  { %p2774_p7 = pnand %p2773_p6, %p2767_p3 }
  0x11   :  { %2777 = shalt.err (!%p2774_p7)
}
  0x12   :  { %s2852_s21 = smov 192   ;;  %s2853_s22 = smov 12  }
  0x13   :  { %44 = dma.hbm_to_vmem [thread:$0]  %s3106_s3, 7680, %s39_s10, [#allocation6], %s2852_s21, %s2852_s21, %s2853_s22  }
  0x14   :  { %s2778_s27 = scalar_lea.hbm %s3104_s1, 7680 }
  0x15   :  { %p2779_p8 = scmp.ne.s32.totalorder %s3104_s1, %s2778_s27  ;;  %p2782_p9 = scmp.lt.u32.totalorder %s2778_s27, %s3104_s1 }
  0x17   :  { %p2784_p10 = pnand %p2782_p9, %p2779_p8 }
  0x19   :  { %2787 = shalt.err (!%p2784_p10)
}
  0x1a   :  { %s2788_s13 = scalar_lea.vmem %s2909_s12, 7680  ;;  %p2793_p12 = scmp.lt.s32.totalorder %s2909_s12, %s2909_s12 }
  0x1b   :  { %p2789_p11 = scmp.ne.s32.totalorder %s2909_s12, %s2788_s13  ;;  %p2794_p13 = scmp.lt.s32.totalorder %s2788_s13, %s2788_s13 }
  0x1d   :  { %p2795_p0 = por %p2794_p13, %p2793_p12 }
  0x1f   :  { %p2796_p1 = pnand %p2795_p0, %p2789_p11 }
  0x21   :  { %2799 = shalt.err (!%p2796_p1)
}
  0x22   :  { %30 = dma.hbm_to_vmem [thread:$0]  %s3104_s1, 7680, %s2909_s12, [#allocation3], %s2852_s21, %s2852_s21, %s2853_s22  }
  0x23   :  { %s2854_s14 = smov [#allocation7]   ;;  %s2800_s18 = scalar_lea.hbm %s3108_s5, 7680 }
  0x24   :  { %s52_s15 = sshll.u32 %s2854_s14, 4  ;;  %p2801_p2 = scmp.ne.s32.totalorder %s3108_s5, %s2800_s18  ;;  %s53_s15 = int_to_ptr.vmem [resolvable:$true] %s52_s15 }
  0x25   :  { %p2804_p3 = scmp.lt.u32.totalorder %s2800_s18, %s3108_s5 }
  0x27   :  { %p2806_p4 = pnand %p2804_p3, %p2801_p2 }
  0x29   :  { %2809 = shalt.err (!%p2806_p4)
}
  0x2a   :  { %s2810_s25 = scalar_lea.vmem %s53_s15, 7680  ;;  %p2815_p6 = scmp.lt.s32.totalorder %s53_s15, %s53_s15 }
  0x2b   :  { %p2811_p5 = scmp.ne.s32.totalorder %s53_s15, %s2810_s25  ;;  %p2816_p7 = scmp.lt.s32.totalorder %s2810_s25, %s2810_s25 }
  0x2d   :  { %p2817_p8 = por %p2816_p7, %p2815_p6 }
  0x2f   :  { %p2818_p9 = pnand %p2817_p8, %p2811_p5 }
  0x31   :  { %2821 = shalt.err (!%p2818_p9)
}
  0x32   :  { %58 = dma.hbm_to_vmem [thread:$0]  %s3108_s5, 7680, %s53_s15, [#allocation6], %s2852_s21, %s2852_s21, %s2853_s22  }
  0x33   :  { %2844 = dma.done.wait [#allocation3], 7680  }
  0x34   :  { %2845 = vsyncadd [#allocation3], 4294959616 }
  0x35   :  { %2846 = dma.done.wait [#allocation6], 15360  }
  0x36   :  { %2847 = vsyncadd [#allocation6], 4294951936  ;;  %v2496_v0 = vld [vmem:[#allocation2 + $0x4] ss:$12 sps:$4 sm:$0xff]   ;;  %v2498_v1 = vld [vmem:[#allocation2] ss:$12 sps:$4 sm:$0xff]  }
  0x37   :  { %502 = vmatprep.subr.bf16.mxu0 %v2496_v0  ;;  %v2499_v2 = vld [vmem:[#allocation2 + $0x1c] ss:$12 sps:$4 sm:$0xff]   ;;  %v2501_v3 = vld [vmem:[#allocation2 + $0x18] ss:$12 sps:$4 sm:$0xff]   ;;  %v2502_v4 = vld [vmem:[#allocation2 + $0x34] ss:$12 sps:$4 sm:$0xff]  }
  0x38   :  { %503 = vmatpush1.bf16.msra.mxu0 %v2498_v1  ;;  %v2504_v5 = vld [vmem:[#allocation2 + $0x30] ss:$12 sps:$4 sm:$0xff]   ;;  %v2505_v6 = vld [vmem:[#allocation2 + $0x4c] ss:$12 sps:$4 sm:$0xff]   ;;  %v2507_v7 = vld [vmem:[#allocation2 + $0x48] ss:$12 sps:$4 sm:$0xff]  }
  0x39   :  { %504 = vmatprep.subr.bf16.mxu0 %v2499_v2  ;;  %v2508_v8 = vld [vmem:[#allocation2 + $0x64] ss:$12 sps:$4 sm:$0xff]   ;;  %v2510_v9 = vld [vmem:[#allocation2 + $0x60] ss:$12 sps:$4 sm:$0xff]   ;;  %v2526_v10 = vld [vmem:[#allocation2 + $0xc8] ss:$12 sps:$4 sm:$0xff]  }
  0x3a   :  { %v2527_v11 = vld [vmem:[#allocation2 + $0x8] ss:$12 sps:$4 sm:$0xff]   ;;  %2313 = vmatprep.subr.bf16.mxu1 %v2526_v10  ;;  %v2531_v13 = vld [vmem:[#allocation2 + $0xe0] ss:$12 sps:$4 sm:$0xff]   ;;  %v2513_v15 = vld [vmem:[#allocation2 + $0x78] ss:$12 sps:$4 sm:$0xff]  }
  0x3b   :  { %v2511_v12 = vld [vmem:[#allocation2 + $0x7c] ss:$12 sps:$4 sm:$0xff]   ;;  %2314 = vmatpush3.bf16.msra.mxu1 %v2527_v11  ;;  %v2532_v14 = vld [vmem:[#allocation2 + $0x20] ss:$12 sps:$4 sm:$0xff]   ;;  %v2536_v17 = vld [vmem:[#allocation2 + $0xf8] ss:$12 sps:$4 sm:$0xff]  }
  0x3c   :  { %505 = vmatpush1.bf16.msra.mxu0 %v2501_v3  ;;  %v2514_v16 = vld [vmem:[#allocation2 + $0x94] ss:$12 sps:$4 sm:$0xff]   ;;  %2315 = vmatprep.subr.bf16.mxu1 %v2531_v13  ;;  %v2537_v18 = vld [vmem:[#allocation2 + $0x38] ss:$12 sps:$4 sm:$0xff]   ;;  %v2516_v19 = vld [vmem:[#allocation2 + $0x90] ss:$12 sps:$4 sm:$0xff]  }
  0x3d   :  { %506 = vmatprep.subr.bf16.mxu0 %v2502_v4  ;;  %v2517_v20 = vld [vmem:[#allocation2 + $0xac] ss:$12 sps:$4 sm:$0xff]   ;;  %v2541_v21 = vld [vmem:[#allocation2 + $0x110] ss:$12 sps:$4 sm:$0xff]   ;;  %v2519_v23 = vld [vmem:[#allocation2 + $0xa8] ss:$12 sps:$4 sm:$0xff]  }
  0x3e   :  { %v2542_v22 = vld [vmem:[#allocation2 + $0x50] ss:$12 sps:$4 sm:$0xff]   ;;  %v2546_v24 = vld [vmem:[#allocation2 + $0x128] ss:$12 sps:$4 sm:$0xff]   ;;  %v2551_v27 = vld [vmem:[#allocation2 + $0x140] ss:$12 sps:$4 sm:$0xff]  }
  0x3f   :  { %2316 = vmatpush3.bf16.msra.mxu1 %v2532_v14  ;;  %v2520_v25 = vld [vmem:[#allocation2 + $0xc4] ss:$12 sps:$4 sm:$0xff]   ;;  %v2547_v26 = vld [vmem:[#allocation2 + $0x68] ss:$12 sps:$4 sm:$0xff]   ;;  %v2522_v28 = vld [vmem:[#allocation2 + $0xc0] ss:$12 sps:$4 sm:$0xff]  }
  0x40   :  { %507 = vmatpush1.bf16.msra.mxu0 %v2504_v5  ;;  %2317 = vmatprep.subr.bf16.mxu1 %v2536_v17  ;;  %v2523_v29 = vld [vmem:[#allocation2 + $0xdc] ss:$12 sps:$4 sm:$0xff]   ;;  %v2552_v30 = vld [vmem:[#allocation2 + $0x80] ss:$12 sps:$4 sm:$0xff]   ;;  %v2556_v31 = vld [vmem:[#allocation2 + $0x158] ss:$12 sps:$4 sm:$0xff]  }
  0x41   :  { %508 = vmatprep.subr.bf16.mxu0 %v2505_v6  ;;  %v2525_v32 = vld [vmem:[#allocation2 + $0xd8] ss:$12 sps:$4 sm:$0xff]   ;;  %v76_v33 = vld [vmem:[%s3103_s0 + $0x8] sm:$0xff]  ;;  %v2528_v34 = vld [vmem:[#allocation2 + $0xf4] ss:$12 sps:$4 sm:$0xff]   ;;  %v2855_v46 = vmov 0.0  }
  0x42   :  { %v79_v35 = vpack.c.bf16 %v76_v33, %v76_v33  ;;  %v2557_v36 = vld [vmem:[#allocation2 + $0x98] ss:$12 sps:$4 sm:$0xff]   ;;  %v2561_v37 = vld [vmem:[#allocation2 + $0x170] ss:$12 sps:$4 sm:$0xff]   ;;  %v2535_v41 = vld [vmem:[#allocation2 + $0x108] ss:$12 sps:$4 sm:$0xff]  }
  0x43   :  { %2318 = vmatpush3.bf16.msra.mxu1 %v2537_v18  ;;  %v2530_v38 = vld [vmem:[#allocation2 + $0xf0] ss:$12 sps:$4 sm:$0xff]   ;;  %v2533_v39 = vld [vmem:[#allocation2 + $0x10c] ss:$12 sps:$4 sm:$0xff]   ;;  %v75_v42 = vld [vmem:[%s3103_s0] sm:$0xff]  ;;  %vm2856_vm0 = vmmov 0  }
  0x44   :  { %509 = vmatpush1.bf16.msra.mxu0 %v2507_v7  ;;  %2319 = vmatprep.subr.bf16.mxu1 %v2541_v21  ;;  %v2562_v40 = vld [vmem:[#allocation2 + $0xb0] ss:$12 sps:$4 sm:$0xff]   ;;  %v2566_v44 = vld [vmem:[#allocation2 + $0x188] ss:$12 sps:$4 sm:$0xff]   ;;  %v78_v45 = vpack.c.bf16 %v75_v42, %v75_v42  ;;  %v2540_v47 = vld [vmem:[#allocation2 + $0x120] ss:$12 sps:$4 sm:$0xff]  }
  0x45   :  { %510 = vmatprep.subr.bf16.mxu0 %v2508_v8  ;;  %534 = vmatprep.mubr.bf16.mxu0 %v79_v35  ;;  %v2538_v43 = vld [vmem:[#allocation2 + $0x124] ss:$12 sps:$4 sm:$0xff]   ;;  %v2543_v48 = vld [vmem:[#allocation2 + $0x13c] ss:$12 sps:$4 sm:$0xff]   ;;  %v2570_v49 = vld [vmem:[#allocation2 + $0x1a0] ss:$12 sps:$4 sm:$0xff]  }
  0x46   :  { %616 = vmatprep.mubr.bf16.mxu1 %v79_v35  ;;  %v2545_v50 = vld [vmem:[#allocation2 + $0x138] ss:$12 sps:$4 sm:$0xff]   ;;  %v2548_v51 = vld [vmem:[#allocation2 + $0x154] ss:$12 sps:$4 sm:$0xff]   ;;  %v2550_v53 = vld [vmem:[#allocation2 + $0x150] ss:$12 sps:$4 sm:$0xff]  }
  0x47   :  { %2320 = vmatpush3.bf16.msra.mxu1 %v2542_v22  ;;  %v2574_v52 = vld [vmem:[#allocation2 + $0x1b8] ss:$12 sps:$4 sm:$0xff]   ;;  %v2575_v55 = vld [vmem:[#allocation2 + $0x1d0] ss:$12 sps:$4 sm:$0xff]   ;;  %v2555_v57 = vld [vmem:[#allocation2 + $0x168] ss:$12 sps:$4 sm:$0xff]  }
  0x48   :  { %511 = vmatpush1.bf16.msra.mxu0 %v2510_v9  ;;  %2321 = vmatprep.subr.bf16.mxu1 %v2546_v24  ;;  %v2553_v54 = vld [vmem:[#allocation2 + $0x16c] ss:$12 sps:$4 sm:$0xff]   ;;  %v2578_v56 = vld [vmem:[#allocation5 + $0x4] ss:$12 sps:$4 sm:$0xff]   ;;  %vm498_vm1 = vcmask 523264   ;;  %v2857_v4 = vmov 0  }
  0x49   :  { %512 = vmatprep.subr.bf16.mxu0 %v2511_v12  ;;  %v77_v58 = vld [vmem:[%s3103_s0 + $0x10] sm:$0xff]  ;;  %v2576_v60 = vld [vmem:[#allocation5] ss:$12 sps:$4 sm:$0xff]   ;;  %v2581_v62 = vld [vmem:[#allocation5 + $0x1c] ss:$12 sps:$4 sm:$0xff]   ;;  %s2858_s1 = smov [#allocation8]  }
  0x4a   :  { %v2560_v59 = vld [vmem:[#allocation2 + $0x184] ss:$12 sps:$4 sm:$0xff]   ;;  %v80_v61 = vpack.c.bf16 %v77_v58, %v77_v58  ;;  %v2558_v63 = vld [vmem:[#allocation2 + $0x180] ss:$12 sps:$4 sm:$0xff]   ;;  %v2565_v0 = vld [vmem:[#allocation2 + $0x19c] ss:$12 sps:$4 sm:$0xff]  }
  0x4b   :  { %2322 = vmatpush3.bf16.msra.mxu1 %v2547_v26  ;;  %v2579_v1 = vld [vmem:[#allocation5 + $0x18] ss:$12 sps:$4 sm:$0xff]   ;;  %v2584_v2 = vld [vmem:[#allocation5 + $0x34] ss:$12 sps:$4 sm:$0xff]   ;;  %v2582_v6 = vld [vmem:[#allocation5 + $0x30] ss:$12 sps:$4 sm:$0xff]  }
  0x4c   :  { %513 = vmatpush1.bf16.msra.mxu0 %v2513_v15  ;;  %2323 = vmatprep.subr.bf16.mxu1 %v2551_v27  ;;  %v2563_v3 = vld [vmem:[#allocation2 + $0x198] ss:$12 sps:$4 sm:$0xff]   ;;  %v2569_v5 = vld [vmem:[#allocation2 + $0x1b4] ss:$12 sps:$4 sm:$0xff]   ;;  %v2567_v8 = vld [vmem:[#allocation2 + $0x1b0] ss:$12 sps:$4 sm:$0xff]  }
  0x4d   :  { %514 = vmatprep.subr.bf16.mxu0 %v2514_v16  ;;  %v2587_v7 = vld [vmem:[#allocation5 + $0x4c] ss:$12 sps:$4 sm:$0xff]   ;;  %v2585_v10 = vld [vmem:[#allocation5 + $0x48] ss:$12 sps:$4 sm:$0xff]   ;;  %v2590_v11 = vld [vmem:[#allocation5 + $0x64] ss:$12 sps:$4 sm:$0xff]  }
  0x4e   :  { %v2573_v9 = vld [vmem:[#allocation2 + $0x1cc] ss:$12 sps:$4 sm:$0xff]   ;;  %v2571_v12 = vld [vmem:[#allocation2 + $0x1c8] ss:$12 sps:$4 sm:$0xff]   ;;  %v2594_v22 = vld [vmem:[#allocation5 + $0x90] ss:$12 sps:$4 sm:$0xff]  }
  0x4f   :  { %2324 = vmatpush3.bf16.msra.mxu1 %v2552_v30  ;;  %v2603_v13 = vld [vmem:[#allocation5 + $0xc8] ss:$12 sps:$4 sm:$0xff]   ;;  %v2588_v14 = vld [vmem:[#allocation5 + $0x60] ss:$12 sps:$4 sm:$0xff]   ;;  %v2591_v16 = vld [vmem:[#allocation5 + $0x78] ss:$12 sps:$4 sm:$0xff]  }
  0x50   :  { %515 = vmatpush1.bf16.msra.mxu0 %v2516_v19  ;;  %2325 = vmatprep.subr.bf16.mxu1 %v2556_v31  ;;  %v2593_v15 = vld [vmem:[#allocation5 + $0x7c] ss:$12 sps:$4 sm:$0xff]   ;;  %v2596_v18 = vld [vmem:[#allocation5 + $0x94] ss:$12 sps:$4 sm:$0xff]   ;;  %v2613_v21 = vld [vmem:[#allocation5 + $0xf8] ss:$12 sps:$4 sm:$0xff]  }
  0x51   :  { %516 = vmatprep.subr.bf16.mxu0 %v2517_v20  ;;  %v2604_v17 = vld [vmem:[#allocation5 + $0x8] ss:$12 sps:$4 sm:$0xff]   ;;  %v2608_v19 = vld [vmem:[#allocation5 + $0xe0] ss:$12 sps:$4 sm:$0xff]   ;;  %v2614_v24 = vld [vmem:[#allocation5 + $0x38] ss:$12 sps:$4 sm:$0xff]  }
  0x52   :  { %v2609_v20 = vld [vmem:[#allocation5 + $0x20] ss:$12 sps:$4 sm:$0xff]   ;;  %v2597_v26 = vld [vmem:[#allocation5 + $0xa8] ss:$12 sps:$4 sm:$0xff]   ;;  %v2602_v27 = vld [vmem:[#allocation5 + $0xc4] ss:$12 sps:$4 sm:$0xff]  }
  0x53   :  { %2326 = vmatpush3.bf16.msra.mxu1 %v2557_v36  ;;  %v2600_v30 = vld [vmem:[#allocation5 + $0xc0] ss:$12 sps:$4 sm:$0xff]   ;;  %v2607_v31 = vld [vmem:[#allocation5 + $0xdc] ss:$12 sps:$4 sm:$0xff]   ;;  %s2095_s12 = sshll.u32 %s2858_s1, 4  ;;  %vm2087_vm2 = vcmask 64512   ;;  %s2096_s12 = int_to_ptr.vmem [resolvable:$true] %s2095_s12 }
  0x54   :  { %517 = vmatpush1.bf16.msra.mxu0 %v2519_v23  ;;  %2327 = vmatprep.subr.bf16.mxu1 %v2561_v37  ;;  %v2599_v23 = vld [vmem:[#allocation5 + $0xac] ss:$12 sps:$4 sm:$0xff]   ;;  %v2612_v35 = vld [vmem:[#allocation5 + $0xf4] ss:$12 sps:$4 sm:$0xff]   ;;  %s2822_s5 = scalar_lea.vmem %s2096_s12, 128  ;;  %p2827_p11 = scmp.lt.s32.totalorder %s2096_s12, %s2096_s12 }
  0x55   :  { %518 = vmatprep.subr.bf16.mxu0 %v2520_v25  ;;  %v2618_v25 = vld [vmem:[#allocation5 + $0x110] ss:$12 sps:$4 sm:$0xff]   ;;  %v2628_v33 = vld [vmem:[#allocation5 + $0x140] ss:$12 sps:$4 sm:$0xff]   ;;  %v2633_v37 = vld [vmem:[#allocation5 + $0x158] ss:$12 sps:$4 sm:$0xff]   ;;  %p2823_p10 = scmp.ne.s32.totalorder %s2096_s12, %s2822_s5  ;;  %p2828_p12 = scmp.lt.s32.totalorder %s2822_s5, %s2822_s5 }
  0x56   :  { %v2629_v36 = vld [vmem:[#allocation5 + $0x80] ss:$12 sps:$4 sm:$0xff]  }
  0x57   :  { %2328 = vmatpush3.bf16.msra.mxu1 %v2562_v40  ;;  %v2615_v40 = vld [vmem:[#allocation5 + $0x108] ss:$12 sps:$4 sm:$0xff]   ;;  %v2620_v42 = vld [vmem:[#allocation5 + $0x120] ss:$12 sps:$4 sm:$0xff]   ;;  %p2829_p13 = por %p2828_p12, %p2827_p11 }
  0x58   :  { %519 = vmatpush1.bf16.msra.mxu0 %v2522_v28  ;;  %2421 = vmatprep.subr.bf16.mxu1 %v2855_v46  ;;  %v2619_v28 = vld [vmem:[#allocation5 + $0x50] ss:$12 sps:$4 sm:$0xff]  }
  0x59   :  { %520 = vmatprep.subr.bf16.mxu0 %v2523_v29  ;;  %v2623_v29 = vld [vmem:[#allocation5 + $0x128] ss:$12 sps:$4 sm:$0xff]   ;;  %p2830_p0 = pnand %p2829_p13, %p2823_p10 }
  0x5a   :  { %617 = vmatmul.mubr.bf16.vlgmr.msra.gmra.mrb[0].mxu1 %v78_v45 }
  0x5b   :  { %2422 = vmatpush3.bf16.msra.mxu1 %v2566_v44  ;;  %2429 = vmatprep.mubr.msk.bf16.mxu1 %vm2856_vm0, %v2855_v46  ;;  %v2625_v44 = vld [vmem:[#allocation5 + $0x138] ss:$12 sps:$4 sm:$0xff]  }
  0x5c   :  { %521 = vmatpush1.bf16.msra.mxu0 %v2525_v32  ;;  %2423 = vmatprep.subr.bf16.mxu1 %v2855_v46  ;;  %v2624_v32 = vld [vmem:[#allocation5 + $0x68] ss:$12 sps:$4 sm:$0xff]  }
  0x5d   :  { %522 = vmatprep.subr.bf16.mxu0 %v2528_v34  ;;  %v2605_v34 = vld [vmem:[#allocation5 + $0xd8] ss:$12 sps:$4 sm:$0xff]  }
  0x5f   :  { %2424 = vmatpush3.bf16.msra.mxu1 %v2570_v49  ;;  %v2637_v49 = vld [vmem:[#allocation5 + $0x16c] ss:$12 sps:$4 sm:$0xff]  }
  0x60   :  { %523 = vmatpush1.bf16.msra.mxu0 %v2530_v38  ;;  %2425 = vmatprep.subr.bf16.mxu1 %v2855_v46  ;;  %v2610_v38 = vld [vmem:[#allocation5 + $0xf0] ss:$12 sps:$4 sm:$0xff]  }
  0x61   :  { %524 = vmatprep.subr.bf16.mxu0 %v2533_v39  ;;  %v2617_v39 = vld [vmem:[#allocation5 + $0x10c] ss:$12 sps:$4 sm:$0xff]  }
  0x63   :  { %2426 = vmatpush3.bf16.msra.mxu1 %v2574_v52  ;;  %v2639_v52 = vld [vmem:[#allocation5 + $0xb0] ss:$12 sps:$4 sm:$0xff]  }
  0x64   :  { %525 = vmatpush1.bf16.msra.mxu0 %v2535_v41  ;;  %2427 = vmatprep.subr.bf16.mxu1 %v2855_v46  ;;  %v2622_v41 = vld [vmem:[#allocation5 + $0x124] ss:$12 sps:$4 sm:$0xff]  }
  0x65   :  { %526 = vmatprep.subr.bf16.mxu0 %v2538_v43  ;;  %v2627_v43 = vld [vmem:[#allocation5 + $0x13c] ss:$12 sps:$4 sm:$0xff]  }
  0x67   :  { %2428 = vmatpush3.bf16.msra.mxu1 %v2575_v55 }
  0x68   :  { %527 = vmatpush1.bf16.msra.mxu0 %v2540_v47  ;;  %1087 = vmatprep.subr.bf16.mxu1 %v2578_v56  ;;  %v2630_v47 = vld [vmem:[#allocation5 + $0x150] ss:$12 sps:$4 sm:$0xff]  }
  0x69   :  { %528 = vmatprep.subr.bf16.mxu0 %v2543_v48  ;;  %v2634_v48 = vld [vmem:[#allocation5 + $0x98] ss:$12 sps:$4 sm:$0xff]  }
  0x6a   :  { %2430 = vmatmul.mubr.msk.bf16.vlgmr.msra.gmra.mrb[4].mxu1 %vm498_vm1, %v80_v61 }
  0x6b   :  { %1088 = vmatpush1.bf16.msra.mxu1 %v2576_v60 }
  0x6c   :  { %529 = vmatpush1.bf16.msra.mxu0 %v2545_v50  ;;  %1089 = vmatprep.subr.bf16.mxu1 %v2581_v62  ;;  %v2638_v50 = vld [vmem:[#allocation5 + $0x170] ss:$12 sps:$4 sm:$0xff]   ;;  %v161_v62 = vld [vmem:[%s3105_s2] sm:$0x7] }
  0x6d   :  { %530 = vmatprep.subr.bf16.mxu0 %v2548_v51  ;;  %v2635_v51 = vld [vmem:[#allocation5 + $0x168] ss:$12 sps:$4 sm:$0xff]  }
  0x6f   :  { %1090 = vmatpush1.bf16.msra.mxu1 %v2579_v1 }
  0x70   :  { %531 = vmatpush1.bf16.msra.mxu0 %v2550_v53  ;;  %1091 = vmatprep.subr.bf16.mxu1 %v2584_v2  ;;  %v2642_v53 = vld [vmem:[#allocation5 + $0x184] ss:$12 sps:$4 sm:$0xff]  }
  0x71   :  { %532 = vmatprep.subr.bf16.mxu0 %v2553_v54  ;;  %v163_v54 = vlaneseq }
  0x73   :  { %1092 = vmatpush1.bf16.msra.mxu1 %v2582_v6 }
  0x74   :  { %533 = vmatpush1.bf16.msra.mxu0 %v2555_v57  ;;  %1093 = vmatprep.subr.bf16.mxu1 %v2587_v7 }
  0x75   :  { %543 = vmatprep.subr.bf16.mxu0 %v2560_v59  ;;  %v164_v59 = vshrl.u32 %v163_v54, 7  ;;  %v2682_v54 = vld [vmem:[#allocation7 + $0xc4] ss:$12 sps:$4 sm:$0xff]  }
  0x77   :  { %535 = vmatmul.mubr.bf16.vlgmr.msra.gmra.mrb[0].mxu0 %v78_v45  ;;  %1094 = vmatpush1.bf16.msra.mxu1 %v2585_v10  ;;  %v2632_v45 = vld [vmem:[#allocation5 + $0x154] ss:$12 sps:$4 sm:$0xff]   ;;  %v2986_v7 = vsub.s32 0, %v164_v59 }
  0x78   :  { %544 = vmatpush1.bf16.msra.mxu0 %v2558_v63  ;;  %575 = vmatprep.mubr.bf16.mxu0 %v2857_v4 }
  0x79   :  { %545 = vmatprep.subr.bf16.mxu0 %v2565_v0  ;;  %1095 = vmatprep.subr.bf16.mxu1 %v2590_v11 }
  0x7b   :  { %1096 = vmatpush1.bf16.msra.mxu1 %v2588_v14 }
  0x7c   :  { %546 = vmatpush1.bf16.msra.mxu0 %v2563_v3  ;;  %1097 = vmatprep.subr.bf16.mxu1 %v2593_v15 }
  0x7d   :  { %547 = vmatprep.subr.bf16.mxu0 %v2569_v5 }
  0x7f   :  { %1098 = vmatpush1.bf16.msra.mxu1 %v2591_v16 }
  0x80   :  { %548 = vmatpush1.bf16.msra.mxu0 %v2567_v8  ;;  %1099 = vmatprep.subr.bf16.mxu1 %v2596_v18  ;;  %v2988_v8 = vsub.s32 1, %v164_v59  ;;  %v2640_v18 = vld [vmem:[#allocation5 + $0x180] ss:$12 sps:$4 sm:$0xff]  }
  0x81   :  { %549 = vmatprep.subr.bf16.mxu0 %v2573_v9  ;;  %v166_v9 = vrot.slane %v161_v62, %v2986_v7 }
  0x82   :  { %v170_v10 = vrot.slane %v161_v62, %v2988_v8 }
  0x83   :  { %1100 = vmatpush1.bf16.msra.mxu1 %v2594_v22  ;;  %v2644_v22 = vld [vmem:[#allocation5 + $0x198] ss:$12 sps:$4 sm:$0xff]  }
  0x84   :  { %550 = vmatpush1.bf16.msra.mxu0 %v2571_v12  ;;  %1101 = vmatprep.subr.bf16.mxu1 %v2599_v23  ;;  %v2647_v23 = vld [vmem:[#allocation5 + $0x1a0] ss:$12 sps:$4 sm:$0xff]  }
  0x85   :  { %2340 = vmatprep.subr.bf16.mxu0 %v2603_v13 }
  0x87   :  { %2165 = vmatmul.mubr.msk.bf16.vlgmr.msra.gmra.mrb[0].mxu0 %vm498_vm1, %v80_v61  ;;  %1102 = vmatpush1.bf16.msra.mxu1 %v2597_v26  ;;  %v2980_v61 = vsub.s32 2, %v164_v59  ;;  %v2651_v26 = vld [vmem:[#allocation5 + $0x1b8] ss:$12 sps:$4 sm:$0xff]   ;;  %v2690_v59 = vld [vmem:[#allocation7 + $0xf0] ss:$12 sps:$4 sm:$0xff]  }
  0x88   :  { %2341 = vmatpush3.bf16.msra.mxu0 %v2604_v17  ;;  %1103 = vmatprep.subr.bf16.mxu1 %v2602_v27  ;;  %v2654_v27 = vld [vmem:[#allocation5 + $0x1cc] ss:$12 sps:$4 sm:$0xff]  }
  0x89   :  { %2342 = vmatprep.subr.bf16.mxu0 %v2608_v19  ;;  %v174_v63 = vrot.slane %v161_v62, %v2980_v61  ;;  %v2643_v19 = vld [vmem:[#allocation5 + $0x188] ss:$12 sps:$4 sm:$0xff]   ;;  %v2698_v62 = vld [vmem:[#allocation7 + $0x110] ss:$12 sps:$4 sm:$0xff]  }
  0x8b   :  { %1104 = vmatpush1.bf16.msra.mxu1 %v2600_v30  ;;  %v2658_v30 = vld [vmem:[#allocation7 + $0x4] ss:$12 sps:$4 sm:$0xff]  }
  0x8c   :  { %2343 = vmatpush3.bf16.msra.mxu0 %v2609_v20  ;;  %1105 = vmatprep.subr.bf16.mxu1 %v2607_v31  ;;  %v2683_v31 = vld [vmem:[#allocation7 + $0xc8] ss:$12 sps:$4 sm:$0xff]  }
  0x8d   :  { %2344 = vmatprep.subr.bf16.mxu0 %v2613_v21  ;;  %v2646_v21 = vld [vmem:[#allocation5 + $0x19c] ss:$12 sps:$4 sm:$0xff]  }
  0x8f   :  { %1106 = vmatpush1.bf16.msra.mxu1 %v2605_v34 }
  0x90   :  { %2345 = vmatpush3.bf16.msra.mxu0 %v2614_v24  ;;  %1107 = vmatprep.subr.bf16.mxu1 %v2612_v35  ;;  %v2650_v24 = vld [vmem:[#allocation5 + $0x1b4] ss:$12 sps:$4 sm:$0xff]   ;;  %v2661_v35 = vld [vmem:[#allocation7 + $0x1c] ss:$12 sps:$4 sm:$0xff]  }
  0x91   :  { %2346 = vmatprep.subr.bf16.mxu0 %v2618_v25  ;;  %v2648_v25 = vld [vmem:[#allocation5 + $0x1b0] ss:$12 sps:$4 sm:$0xff]  }
  0x93   :  { %1108 = vmatpush1.bf16.msra.mxu1 %v2610_v38  ;;  %v2689_v38 = vld [vmem:[#allocation7 + $0x20] ss:$12 sps:$4 sm:$0xff]  }
  0x94   :  { %2347 = vmatpush3.bf16.msra.mxu0 %v2619_v28  ;;  %1109 = vmatprep.subr.bf16.mxu1 %v2617_v39  ;;  %v2652_v28 = vld [vmem:[#allocation5 + $0x1c8] ss:$12 sps:$4 sm:$0xff]  }
  0x95   :  { %2348 = vmatprep.subr.bf16.mxu0 %v2623_v29  ;;  %v2655_v29 = vld [vmem:[#allocation5 + $0x1d0] ss:$12 sps:$4 sm:$0xff]   ;;  %v2664_v39 = vld [vmem:[#allocation7 + $0x34] ss:$12 sps:$4 sm:$0xff]  }
  0x97   :  { %1110 = vmatpush1.bf16.msra.mxu1 %v2615_v40  ;;  %v2693_v40 = vld [vmem:[#allocation7 + $0xf8] ss:$12 sps:$4 sm:$0xff]  }
  0x98   :  { %2349 = vmatpush3.bf16.msra.mxu0 %v2624_v32  ;;  %1111 = vmatprep.subr.bf16.mxu1 %v2622_v41  ;;  %v2656_v32 = vld [vmem:[#allocation7] ss:$12 sps:$4 sm:$0xff]   ;;  %v2662_v41 = vld [vmem:[#allocation7 + $0x30] ss:$12 sps:$4 sm:$0xff]  }
  0x99   :  { %2350 = vmatprep.subr.bf16.mxu0 %v2628_v33  ;;  %v2684_v33 = vld [vmem:[#allocation7 + $0x8] ss:$12 sps:$4 sm:$0xff]  }
  0x9b   :  { %1112 = vmatpush1.bf16.msra.mxu1 %v2620_v42  ;;  %v2694_v42 = vld [vmem:[#allocation7 + $0x38] ss:$12 sps:$4 sm:$0xff]  }
  0x9c   :  { %2351 = vmatpush3.bf16.msra.mxu0 %v2629_v36  ;;  %1113 = vmatprep.subr.bf16.mxu1 %v2627_v43  ;;  %v2688_v36 = vld [vmem:[#allocation7 + $0xe0] ss:$12 sps:$4 sm:$0xff]  }
  0x9d   :  { %2352 = vmatprep.subr.bf16.mxu0 %v2633_v37  ;;  %v2659_v37 = vld [vmem:[#allocation7 + $0x18] ss:$12 sps:$4 sm:$0xff]  }
  0x9e   :  { %v2667_v43 = vld [vmem:[#allocation7 + $0x4c] ss:$12 sps:$4 sm:$0xff]  }
  0x9f   :  { %1114 = vmatpush1.bf16.msra.mxu1 %v2625_v44  ;;  %v2665_v44 = vld [vmem:[#allocation7 + $0x48] ss:$12 sps:$4 sm:$0xff]  }
  0xa0   :  { %1115 = vmatprep.subr.bf16.mxu1 %v2632_v45  ;;  %2353 = vmatpush3.bf16.msra.mxu0 %v2634_v48  ;;  %v2670_v45 = vld [vmem:[#allocation7 + $0x64] ss:$12 sps:$4 sm:$0xff]   ;;  %v2673_v48 = vld [vmem:[#allocation7 + $0x7c] ss:$12 sps:$4 sm:$0xff]  }
  0xa1   :  { %2354 = vmatprep.subr.bf16.mxu0 %v2638_v50  ;;  %v2676_v50 = vld [vmem:[#allocation7 + $0x94] ss:$12 sps:$4 sm:$0xff]  }
  0xa3   :  { %1116 = vmatpush1.bf16.msra.mxu1 %v2630_v47  ;;  %v2668_v47 = vld [vmem:[#allocation7 + $0x60] ss:$12 sps:$4 sm:$0xff]  }
  0xa4   :  { %1117 = vmatprep.subr.bf16.mxu1 %v2637_v49  ;;  %2355 = vmatpush3.bf16.msra.mxu0 %v2639_v52  ;;  %v2671_v49 = vld [vmem:[#allocation7 + $0x78] ss:$12 sps:$4 sm:$0xff]  }
  0xa5   :  { %2433 = vmatprep.subr.bf16.mxu0 %v2855_v46  ;;  %v2679_v52 = vld [vmem:[#allocation7 + $0xac] ss:$12 sps:$4 sm:$0xff]  }
  0xa7   :  { %1118 = vmatpush1.bf16.msra.mxu1 %v2635_v51  ;;  %v2674_v51 = vld [vmem:[#allocation7 + $0x90] ss:$12 sps:$4 sm:$0xff]  }
  0xa8   :  { %1128 = vmatprep.subr.bf16.mxu1 %v2642_v53  ;;  %v2677_v53 = vld [vmem:[#allocation7 + $0xa8] ss:$12 sps:$4 sm:$0xff]  }
 0x12d   :  { %v2329_v55 = vpop.f32.mrb[0].mxu1 }
 0x12e   :  { %v2330_v56 = vpop.f32.mrb[1].mxu1 }
 0x12f   :  { %v2331_v57 = vadd.f32 %v2330_v56, %v2329_v55  ;;  %v2332_v58 = vpop.f32.mrb[2].mxu1  ;;  %v2680_v55 = vld [vmem:[#allocation7 + $0xc0] ss:$12 sps:$4 sm:$0xff]   ;;  %v2687_v56 = vld [vmem:[#allocation7 + $0xdc] ss:$12 sps:$4 sm:$0xff]  }
 0x130   :  { %v2333_v60 = vpop.f32.mrb[3].mxu1  ;;  %v2692_v58 = vld [vmem:[#allocation7 + $0xf4] ss:$12 sps:$4 sm:$0xff]  }
 0x131   :  { %v619_v0 = vadd.f32 %v2331_v57, %v174_v63  ;;  %v2685_v57 = vld [vmem:[#allocation7 + $0xd8] ss:$12 sps:$4 sm:$0xff]   ;;  %v2695_v63 = vld [vmem:[#allocation7 + $0x108] ss:$12 sps:$4 sm:$0xff]  }
 0x132   :  { %v2697_v60 = vld [vmem:[#allocation7 + $0x10c] ss:$12 sps:$4 sm:$0xff]  }
 0x13d   :  { %v658_v1 = vpop.f32.mrb[4].mxu1 }
 0x13e   :  { %v659_v2 = vadd.f32 %v658_v1, %v619_v0  ;;  %v2431_v3 = vpop.f32.mrb[5].mxu1  ;;  %v2699_v0 = vld [vmem:[#allocation7 + $0x50] ss:$12 sps:$4 sm:$0xff]   ;;  %v2700_v1 = vld [vmem:[#allocation7 + $0x120] ss:$12 sps:$4 sm:$0xff]  }
 0x13f   :  { %v661_v5 = vpop.f32.mrb[6].mxu1  ;;  %v2703_v3 = vld [vmem:[#allocation7 + $0x128] ss:$12 sps:$4 sm:$0xff]  }
 0x140   :  { %v2432_v6 = vpop.f32.mrb[7].mxu1  ;;  %v666_v34 = vpack.c.bf16 %v659_v2, %v659_v2  ;;  %v2702_v2 = vld [vmem:[#allocation7 + $0x124] ss:$12 sps:$4 sm:$0xff]   ;;  %v2704_v5 = vld [vmem:[#allocation7 + $0x68] ss:$12 sps:$4 sm:$0xff]  }
 0x141   :  { %v2707_v6 = vld [vmem:[#allocation7 + $0x13c] ss:$12 sps:$4 sm:$0xff]  }
 0x15a   :  { %v577_v11 = vpop.f32.mrb[0].mxu0 }
 0x15b   :  { %v2469_v12 = vadd.f32 %v577_v11, %v166_v9  ;;  %v579_v13 = vpop.f32.mrb[1].mxu0  ;;  %v2708_v9 = vld [vmem:[#allocation7 + $0x140] ss:$12 sps:$4 sm:$0xff]  }
 0x15c   :  { %v2470_v14 = vadd.f32 %v579_v13, %v170_v10  ;;  %v581_v15 = vpop.f32.mrb[2].mxu0  ;;  %v2705_v10 = vld [vmem:[#allocation7 + $0x138] ss:$12 sps:$4 sm:$0xff]   ;;  %v2709_v11 = vld [vmem:[#allocation7 + $0x80] ss:$12 sps:$4 sm:$0xff]  }
 0x15d   :  { %v582_v16 = vpop.f32.mrb[3].mxu0  ;;  %v664_v20 = vpack.c.bf16 %v2469_v12, %v2469_v12  ;;  %v2712_v12 = vld [vmem:[#allocation7 + $0x154] ss:$12 sps:$4 sm:$0xff]   ;;  %v2713_v13 = vld [vmem:[#allocation7 + $0x158] ss:$12 sps:$4 sm:$0xff]  }
 0x15e   :  { %v665_v17 = vpack.c.bf16 %v2470_v14, %v2470_v14  ;;  %v2710_v14 = vld [vmem:[#allocation7 + $0x150] ss:$12 sps:$4 sm:$0xff]   ;;  %v2714_v15 = vld [vmem:[#allocation7 + $0x98] ss:$12 sps:$4 sm:$0xff]  }
 0x15f   :  { %v2717_v16 = vld [vmem:[#allocation7 + $0x16c] ss:$12 sps:$4 sm:$0xff]  }
 0x160   :  { %1119 = vmatprep.mubr.bf16.mxu1 %v665_v17  ;;  %1201 = vmatprep.mubr.bf16.mxu0 %v665_v17  ;;  %v2718_v17 = vld [vmem:[#allocation7 + $0x170] ss:$12 sps:$4 sm:$0xff]  }
 0x161   :  { %1120 = vmatmul.mubr.bf16.vlgmr.msra.gmra.mrb[8].mxu1 %v664_v20  ;;  %1202 = vmatmul.mubr.bf16.vlgmr.msra.gmra.mrb[4].mxu0 %v664_v20  ;;  %v2722_v20 = vld [vmem:[#allocation7 + $0x184] ss:$12 sps:$4 sm:$0xff]  }
 0x162   :  { %1129 = vmatpush1.bf16.msra.mxu1 %v2640_v18  ;;  %2434 = vmatpush3.bf16.msra.mxu0 %v2643_v19  ;;  %v2715_v18 = vld [vmem:[#allocation7 + $0x168] ss:$12 sps:$4 sm:$0xff]   ;;  %v2719_v19 = vld [vmem:[#allocation7 + $0xb0] ss:$12 sps:$4 sm:$0xff]  }
 0x163   :  { %1130 = vmatprep.subr.bf16.mxu1 %v2646_v21  ;;  %2435 = vmatprep.subr.bf16.mxu0 %v2855_v46 }
 0x164   :  { %1160 = vmatprep.mubr.bf16.mxu1 %v2857_v4  ;;  %2441 = vmatprep.mubr.msk.bf16.mxu0 %vm2856_vm0, %v2855_v46 }
 0x166   :  { %1131 = vmatpush1.bf16.msra.mxu1 %v2644_v22  ;;  %2436 = vmatpush3.bf16.msra.mxu0 %v2647_v23 }
 0x167   :  { %1132 = vmatprep.subr.bf16.mxu1 %v2650_v24  ;;  %2437 = vmatprep.subr.bf16.mxu0 %v2855_v46 }
 0x16a   :  { %1133 = vmatpush1.bf16.msra.mxu1 %v2648_v25  ;;  %2438 = vmatpush3.bf16.msra.mxu0 %v2651_v26  ;;  %v747_v26 = vld [vmem:[%s3107_s4] sm:$0x7] }
 0x16b   :  { %1134 = vmatprep.subr.bf16.mxu1 %v2654_v27  ;;  %2439 = vmatprep.subr.bf16.mxu0 %v2855_v46  ;;  %v760_v27 = vrot.slane %v747_v26, %v2980_v61 }
 0x16e   :  { %1135 = vmatpush1.bf16.msra.mxu1 %v2652_v28  ;;  %2440 = vmatpush3.bf16.msra.mxu0 %v2655_v29  ;;  %v752_v28 = vrot.slane %v747_v26, %v2986_v7  ;;  %v756_v29 = vrot.slane %v747_v26, %v2988_v8 }
 0x16f   :  { %1672 = vmatprep.subr.bf16.mxu0 %v2658_v30  ;;  %2367 = vmatprep.subr.bf16.mxu1 %v2683_v31 }
 0x171   :  { %2227 = vmatmul.mubr.msk.bf16.vlgmr.msra.gmra.mrb[8].mxu1 %vm498_vm1, %v666_v34  ;;  %2442 = vmatmul.mubr.msk.bf16.vlgmr.msra.gmra.mrb[8].mxu0 %vm498_vm1, %v666_v34 }
 0x172   :  { %1673 = vmatpush1.bf16.msra.mxu0 %v2656_v32  ;;  %2368 = vmatpush3.bf16.msra.mxu1 %v2684_v33 }
 0x173   :  { %1674 = vmatprep.subr.bf16.mxu0 %v2661_v35  ;;  %2369 = vmatprep.subr.bf16.mxu1 %v2688_v36 }
 0x176   :  { %1675 = vmatpush1.bf16.msra.mxu0 %v2659_v37  ;;  %2370 = vmatpush3.bf16.msra.mxu1 %v2689_v38 }
 0x177   :  { %1676 = vmatprep.subr.bf16.mxu0 %v2664_v39  ;;  %2371 = vmatprep.subr.bf16.mxu1 %v2693_v40 }
 0x17a   :  { %1677 = vmatpush1.bf16.msra.mxu0 %v2662_v41  ;;  %2372 = vmatpush3.bf16.msra.mxu1 %v2694_v42 }
 0x17b   :  { %1678 = vmatprep.subr.bf16.mxu0 %v2667_v43  ;;  %2373 = vmatprep.subr.bf16.mxu1 %v2698_v62  ;;  %v2720_v43 = vld [vmem:[#allocation7 + $0x180] ss:$12 sps:$4 sm:$0xff]   ;;  %v2741_v62 = vld [vmem:[%s3110_s7 + $0x10] sm:$0xff]  }
 0x17e   :  { %1679 = vmatpush1.bf16.msra.mxu0 %v2665_v44  ;;  %2374 = vmatpush3.bf16.msra.mxu1 %v2699_v0  ;;  %v2723_v44 = vld [vmem:[#allocation7 + $0x188] ss:$12 sps:$4 sm:$0xff]   ;;  %v2743_v0 = vld [vmem:[%s3110_s7 + $0x18] sm:$0xff]  }
 0x17f   :  { %1680 = vmatprep.subr.bf16.mxu0 %v2670_v45  ;;  %2375 = vmatprep.subr.bf16.mxu1 %v2703_v3  ;;  %v2746_v3 = vld [vmem:[%s3110_s7 + $0x20] sm:$0xff]  }
 0x182   :  { %1681 = vmatpush1.bf16.msra.mxu0 %v2668_v47  ;;  %2376 = vmatpush3.bf16.msra.mxu1 %v2704_v5  ;;  %v2726_v47 = vld [vmem:[#allocation7 + $0x19c] ss:$12 sps:$4 sm:$0xff]  }
 0x183   :  { %1682 = vmatprep.subr.bf16.mxu0 %v2673_v48  ;;  %2377 = vmatprep.subr.bf16.mxu1 %v2708_v9  ;;  %v2724_v48 = vld [vmem:[#allocation7 + $0x198] ss:$12 sps:$4 sm:$0xff]   ;;  %v2747_v5 = vld [vmem:[%s3110_s7 + $0x88] sm:$0xff]  }
 0x184   :  { %v2749_v9 = vld [vmem:[%s3110_s7 + $0x28] sm:$0xff]  }
 0x186   :  { %1683 = vmatpush1.bf16.msra.mxu0 %v2671_v49  ;;  %2378 = vmatpush3.bf16.msra.mxu1 %v2709_v11  ;;  %v2727_v49 = vld [vmem:[#allocation7 + $0x1a0] ss:$12 sps:$4 sm:$0xff]   ;;  %v2751_v11 = vld [vmem:[%s3110_s7 + $0x70] sm:$0xff]  }
 0x187   :  { %1684 = vmatprep.subr.bf16.mxu0 %v2676_v50  ;;  %2379 = vmatprep.subr.bf16.mxu1 %v2713_v13  ;;  %v2730_v50 = vld [vmem:[#allocation7 + $0x1b4] ss:$12 sps:$4 sm:$0xff]   ;;  %v2753_v13 = vld [vmem:[%s3110_s7 + $0x98] sm:$0xff]  }
 0x18a   :  { %1685 = vmatpush1.bf16.msra.mxu0 %v2674_v51  ;;  %2380 = vmatpush3.bf16.msra.mxu1 %v2714_v15  ;;  %v2728_v51 = vld [vmem:[#allocation7 + $0x1b0] ss:$12 sps:$4 sm:$0xff]  }
 0x18b   :  { %1686 = vmatprep.subr.bf16.mxu0 %v2679_v52  ;;  %2381 = vmatprep.subr.bf16.mxu1 %v2718_v17  ;;  %v2731_v52 = vld [vmem:[#allocation7 + $0x1b8] ss:$12 sps:$4 sm:$0xff]  }
 0x18c   :  { %v2755_v15 = vld [vmem:[%s3110_s7 + $0x38] sm:$0xff]  }
 0x18e   :  { %1687 = vmatpush1.bf16.msra.mxu0 %v2677_v53  ;;  %2382 = vmatpush3.bf16.msra.mxu1 %v2719_v19  ;;  %v2734_v53 = vld [vmem:[#allocation7 + $0x1cc] ss:$12 sps:$4 sm:$0xff]  }
 0x18f   :  { %1688 = vmatprep.subr.bf16.mxu0 %v2682_v54  ;;  %2445 = vmatprep.subr.bf16.mxu1 %v2855_v46  ;;  %v2732_v54 = vld [vmem:[#allocation7 + $0x1c8] ss:$12 sps:$4 sm:$0xff]  }
 0x192   :  { %1689 = vmatpush1.bf16.msra.mxu0 %v2680_v55  ;;  %v2735_v55 = vld [vmem:[#allocation7 + $0x1d0] ss:$12 sps:$4 sm:$0xff]  }
 0x193   :  { %1690 = vmatprep.subr.bf16.mxu0 %v2687_v56  ;;  %v2737_v56 = vld [vmem:[%s3110_s7] sm:$0xff]  }
 0x196   :  { %1691 = vmatpush1.bf16.msra.mxu0 %v2685_v57 }
 0x197   :  { %1692 = vmatprep.subr.bf16.mxu0 %v2692_v58  ;;  %v2738_v58 = vld [vmem:[%s3110_s7 + $0x48] sm:$0xff]  }
 0x19a   :  { %1693 = vmatpush1.bf16.msra.mxu0 %v2690_v59  ;;  %v2739_v59 = vld [vmem:[%s3110_s7 + $0x8] sm:$0xff]  }
 0x19b   :  { %1694 = vmatprep.subr.bf16.mxu0 %v2697_v60  ;;  %v2740_v60 = vld [vmem:[%s3110_s7 + $0x50] sm:$0xff]  }
 0x19e   :  { %1695 = vmatpush1.bf16.msra.mxu0 %v2695_v63  ;;  %v2742_v63 = vld [vmem:[%s3110_s7 + $0x58] sm:$0xff]  }
 0x19f   :  { %1696 = vmatprep.subr.bf16.mxu0 %v2702_v2  ;;  %v2745_v2 = vld [vmem:[%s3110_s7 + $0x60] sm:$0xff]  }
 0x1a2   :  { %1697 = vmatpush1.bf16.msra.mxu0 %v2700_v1  ;;  %v2744_v1 = vld [vmem:[%s3110_s7 + $0x80] sm:$0xff]  }
 0x1a3   :  { %1698 = vmatprep.subr.bf16.mxu0 %v2707_v6  ;;  %v2748_v6 = vld [vmem:[%s3110_s7 + $0x68] sm:$0xff]  }
 0x1a6   :  { %1699 = vmatpush1.bf16.msra.mxu0 %v2705_v10  ;;  %v2750_v10 = vld [vmem:[%s3110_s7 + $0x90] sm:$0xff]  }
 0x1a7   :  { %1700 = vmatprep.subr.bf16.mxu0 %v2712_v12  ;;  %v2752_v12 = vld [vmem:[%s3110_s7 + $0x30] sm:$0xff]  }
 0x1aa   :  { %1701 = vmatpush1.bf16.msra.mxu0 %v2710_v14  ;;  %v2754_v14 = vld [vmem:[%s3110_s7 + $0x78] sm:$0xff]  }
 0x1ab   :  { %1702 = vmatprep.subr.bf16.mxu0 %v2717_v16 }
 0x1ae   :  { %1703 = vmatpush1.bf16.msra.mxu0 %v2715_v18 }
 0x1af   :  { %1713 = vmatprep.subr.bf16.mxu0 %v2722_v20  ;;  %v1332_v20 = vld [vmem:[%s3109_s6] sm:$0x7] }
 0x234   :  { %v2356_v21 = vpop.f32.mrb[4].mxu0 }
 0x235   :  { %v2357_v22 = vpop.f32.mrb[5].mxu0 }
 0x236   :  { %v2358_v23 = vadd.f32 %v2357_v22, %v2356_v21  ;;  %v2359_v24 = vpop.f32.mrb[6].mxu0  ;;  %v1345_v21 = vrot.slane %v1332_v20, %v2980_v61  ;;  %v1337_v22 = vrot.slane %v1332_v20, %v2986_v7 }
 0x237   :  { %v2360_v25 = vpop.f32.mrb[7].mxu0 }
 0x238   :  { %v1204_v30 = vadd.f32 %v2358_v23, %v760_v27  ;;  %v1341_v23 = vrot.slane %v1332_v20, %v2988_v8 }
 0x244   :  { %v1162_v31 = vpop.f32.mrb[8].mxu1  ;;  %v1243_v32 = vpop.f32.mrb[8].mxu0 }
 0x245   :  { %v2471_v33 = vadd.f32 %v1162_v31, %v752_v28  ;;  %v1244_v34 = vadd.f32 %v1243_v32, %v1204_v30  ;;  %v1164_v35 = vpop.f32.mrb[9].mxu1  ;;  %v2443_v36 = vpop.f32.mrb[9].mxu0 }
 0x246   :  { %v2472_v37 = vadd.f32 %v1164_v35, %v756_v29  ;;  %v1166_v38 = vpop.f32.mrb[10].mxu1  ;;  %v1246_v39 = vpop.f32.mrb[10].mxu0 }
 0x247   :  { %v1167_v40 = vpop.f32.mrb[11].mxu1  ;;  %v2444_v41 = vpop.f32.mrb[11].mxu0  ;;  %v1249_v45 = vpack.c.bf16 %v2471_v33, %v2471_v33  ;;  %v1251_v57 = vpack.c.bf16 %v1244_v34, %v1244_v34 }
 0x248   :  { %v1250_v42 = vpack.c.bf16 %v2472_v37, %v2472_v37  ;;  %v2291_v40 = vld [vmem:[%s3111_s8] ss:$0 sm:$0xff] }
 0x24a   :  { %1704 = vmatprep.mubr.bf16.mxu0 %v1250_v42  ;;  %1786 = vmatprep.mubr.bf16.mxu1 %v1250_v42 }
 0x24b   :  { %1705 = vmatmul.mubr.bf16.vlgmr.msra.gmra.mrb[12].mxu0 %v1249_v45  ;;  %1787 = vmatmul.mubr.bf16.vlgmr.msra.gmra.mrb[12].mxu1 %v1249_v45 }
 0x24c   :  { %1714 = vmatpush1.bf16.msra.mxu0 %v2720_v43  ;;  %2446 = vmatpush3.bf16.msra.mxu1 %v2723_v44 }
 0x24d   :  { %1715 = vmatprep.subr.bf16.mxu0 %v2726_v47  ;;  %2447 = vmatprep.subr.bf16.mxu1 %v2855_v46 }
 0x24e   :  { %1745 = vmatprep.mubr.bf16.mxu0 %v2857_v4  ;;  %2453 = vmatprep.mubr.msk.bf16.mxu1 %vm2856_vm0, %v2855_v46  ;;  %v2736_v4 = vld [vmem:[%s3110_s7 + $0x40] sm:$0xff]  }
 0x250   :  { %1716 = vmatpush1.bf16.msra.mxu0 %v2724_v48  ;;  %2448 = vmatpush3.bf16.msra.mxu1 %v2727_v49 }
 0x251   :  { %1717 = vmatprep.subr.bf16.mxu0 %v2730_v50  ;;  %2449 = vmatprep.subr.bf16.mxu1 %v2855_v46 }
 0x254   :  { %1718 = vmatpush1.bf16.msra.mxu0 %v2728_v51  ;;  %2450 = vmatpush3.bf16.msra.mxu1 %v2731_v52 }
 0x255   :  { %1719 = vmatprep.subr.bf16.mxu0 %v2734_v53  ;;  %2451 = vmatprep.subr.bf16.mxu1 %v2855_v46 }
 0x258   :  { %1720 = vmatpush1.bf16.msra.mxu0 %v2732_v54  ;;  %2452 = vmatpush3.bf16.msra.mxu1 %v2735_v55 }
 0x259   :  { %2394 = vmatprep.subr.bf16.mxu1 %v2736_v4  ;;  %2457 = vmatprep.subr.bf16.mxu0 %v2855_v46 }
 0x25b   :  { %2289 = vmatmul.mubr.msk.bf16.vlgmr.msra.gmra.mrb[12].mxu0 %vm498_vm1, %v1251_v57  ;;  %2454 = vmatmul.mubr.msk.bf16.vlgmr.msra.gmra.mrb[16].mxu1 %vm498_vm1, %v1251_v57 }
 0x25c   :  { %2395 = vmatpush3.bf16.msra.mxu1 %v2737_v56  ;;  %2465 = vmatprep.mubr.msk.bf16.mxu0 %vm2856_vm0, %v2855_v46 }
 0x25d   :  { %2396 = vmatprep.subr.bf16.mxu1 %v2738_v58  ;;  %2458 = vmatpush3.bf16.msra.mxu0 %v2744_v1 }
 0x25e   :  { %2459 = vmatprep.subr.bf16.mxu0 %v2855_v46 }
 0x260   :  { %2397 = vmatpush3.bf16.msra.mxu1 %v2739_v59 }
 0x261   :  { %2398 = vmatprep.subr.bf16.mxu1 %v2740_v60  ;;  %2460 = vmatpush3.bf16.msra.mxu0 %v2747_v5 }
 0x262   :  { %2461 = vmatprep.subr.bf16.mxu0 %v2855_v46 }
 0x264   :  { %2399 = vmatpush3.bf16.msra.mxu1 %v2741_v62 }
 0x265   :  { %2400 = vmatprep.subr.bf16.mxu1 %v2742_v63  ;;  %2462 = vmatpush3.bf16.msra.mxu0 %v2750_v10 }
 0x266   :  { %2463 = vmatprep.subr.bf16.mxu0 %v2855_v46 }
 0x268   :  { %2401 = vmatpush3.bf16.msra.mxu1 %v2743_v0 }
 0x269   :  { %2402 = vmatprep.subr.bf16.mxu1 %v2745_v2  ;;  %2464 = vmatpush3.bf16.msra.mxu0 %v2753_v13 }
 0x26c   :  { %2403 = vmatpush3.bf16.msra.mxu1 %v2746_v3 }
 0x26d   :  { %2404 = vmatprep.subr.bf16.mxu1 %v2748_v6 }
 0x270   :  { %2405 = vmatpush3.bf16.msra.mxu1 %v2749_v9 }
 0x271   :  { %2406 = vmatprep.subr.bf16.mxu1 %v2751_v11 }
 0x274   :  { %2407 = vmatpush3.bf16.msra.mxu1 %v2752_v12 }
 0x275   :  { %2408 = vmatprep.subr.bf16.mxu1 %v2754_v14 }
 0x278   :  { %2409 = vmatpush3.bf16.msra.mxu1 %v2755_v15 }
 0x31e   :  { %v2383_v16 = vpop.f32.mrb[12].mxu1 }
 0x31f   :  { %v2384_v17 = vpop.f32.mrb[13].mxu1 }
 0x320   :  { %v2385_v18 = vadd.f32 %v2384_v17, %v2383_v16  ;;  %v2386_v46 = vpop.f32.mrb[14].mxu1 }
 0x321   :  { %v2387_v19 = vpop.f32.mrb[15].mxu1 }
 0x322   :  { %v1789_v24 = vadd.f32 %v2385_v18, %v1345_v21 }
 0x32e   :  { %v1747_v25 = vpop.f32.mrb[12].mxu0  ;;  %v1828_v26 = vpop.f32.mrb[16].mxu1 }
 0x32f   :  { %v2473_v27 = vadd.f32 %v1747_v25, %v1337_v22  ;;  %v1829_v28 = vadd.f32 %v1828_v26, %v1789_v24  ;;  %v1749_v29 = vpop.f32.mrb[13].mxu0  ;;  %v2455_v30 = vpop.f32.mrb[17].mxu1 }
 0x330   :  { %v2474_v31 = vadd.f32 %v1749_v29, %v1341_v23  ;;  %v1751_v32 = vpop.f32.mrb[14].mxu0  ;;  %v1831_v33 = vpop.f32.mrb[18].mxu1 }
 0x331   :  { %v1836_v34 = vpack.c.bf16 %v1829_v28, %v1829_v28  ;;  %v1752_v35 = vpop.f32.mrb[15].mxu0  ;;  %v2456_v36 = vpop.f32.mrb[19].mxu1  ;;  %v1834_v38 = vpack.c.bf16 %v2473_v27, %v2473_v27 }
 0x332   :  { %v1835_v37 = vpack.c.bf16 %v2474_v31, %v2474_v31 }
 0x333   :  { %2466 = vmatmul.mubr.msk.bf16.vlgmr.msra.gmra.mrb[16].mxu0 %vm498_vm1, %v1836_v34 }
 0x334   :  { %2039 = vmatprep.mubr.bf16.mxu1 %v1835_v37 }
 0x335   :  { %2040 = vmatmul.mubr.bf16.vlgmr.msra.gmra.mrb[20].mxu1 %v1834_v38 }
 0x406   :  { %v2081_v61 = vpop.f32.mrb[16].mxu0 }
 0x407   :  { %v2467_v7 = vpop.f32.mrb[17].mxu0 }
 0x408   :  { %v2410_v8 = vpop.f32.mrb[20].mxu1  ;;  %v2084_v39 = vpop.f32.mrb[18].mxu0 }
 0x409   :  { %v2411_v41 = vpop.f32.mrb[21].mxu1  ;;  %v2468_v42 = vpop.f32.mrb[19].mxu0 }
 0x40a   :  { %v2412_v43 = vadd.f32 %v2411_v41, %v2410_v8  ;;  %v2413_v44 = vpop.f32.mrb[22].mxu1 }
 0x40b   :  { %v2414_v45 = vpop.f32.mrb[23].mxu1 }
 0x40c   :  { %v2042_v47 = vadd.f32 %v2412_v43, %v2291_v40 }
 0x40e   :  { %v2082_v48 = vadd.f32 %v2081_v61, %v2042_v47 }
 0x410   :  { %2088 = vst.msk [vmem:[#allocation8] sm:$0xff] %vm2087_vm2, %v2082_v48 }
 0x411   :  { %2833 = shalt.err (!%p2830_p0)
}
 0x412   :  { %s2834_s22 = scalar_lea.hbm %s3112_s9, 128 }
 0x413   :  { %p2835_p1 = scmp.ne.s32.totalorder %s3112_s9, %s2834_s22  ;;  %p2838_p2 = scmp.lt.u32.totalorder %s2834_s22, %s3112_s9 }
 0x415   :  { %p2840_p3 = pnand %p2838_p2, %p2835_p1 }
 0x417   :  { %2843 = shalt.err (!%p2840_p3)
}
 0x418   :  { %2098 = dma.vmem_to_hbm [thread:$0]  %s2096_s12, 128, %s3112_s9, [#allocation4]  }
 0x419   :  { %2848 = dma.done.wait [#allocation4], 128  }
 0x41a   :  { %2849 = vsyncadd [#allocation4], 4294967168 }
 0x41b   :  { %2102 = vsyncpa [#allocation3], 1 }
 0x41c   :  { %2103 = vsyncpa [#allocation6], 1 }
 0x41d   :  { %2104 = vsyncpa [#allocation4], 1 }

</bundles_post_ra>
